<compile_context>
chip_gen: v7x
topology: tpu7x:2x2x1
jax: 0.10.0
libtpu: 0.0.40
codegen_flags: <defaults>
</compile_context>

<pallas_src>
import functools
import math

import jax
import jax.numpy as jnp
from jax.experimental import pallas as pl
from jax.experimental.pallas import tpu as pltpu


def _flash_attn_kernel(q_in_ref, k_in_ref, v_in_ref,
                       wq_ref, bq_ref, wk_ref, bk_ref, wv_ref, bv_ref,
                       o_ref,
                       q_buf, m_buf, l_buf, acc_buf,
                       *, scale):
    kv = pl.program_id(2)

    # ---- init + Q projection: once per (batch, q-tile) ----
    @pl.when(kv == 0)
    def _():
        xq = q_in_ref[0].astype(jnp.bfloat16)                       # (tq, H)
        q = jnp.dot(xq, wq_ref[...],                                # bf16 x bf16
                    preferred_element_type=jnp.float32) + bq_ref[...]
        q_buf[...] = q * scale                                      # pre-scaled, f32
        m_buf[...] = jnp.full_like(m_buf, -jnp.inf)
        l_buf[...] = jnp.zeros_like(l_buf)
        acc_buf[...] = jnp.zeros_like(acc_buf)

    # ---- K / V projection for this kv tile (bf16 MXU operands, f32 acc) ----
    xk = k_in_ref[0].astype(jnp.bfloat16)                           # (tkv, H)
    xv = v_in_ref[0].astype(jnp.bfloat16)
    k = jnp.dot(xk, wk_ref[...], preferred_element_type=jnp.float32) + bk_ref[...]
    v = jnp.dot(xv, wv_ref[...], preferred_element_type=jnp.float32) + bv_ref[...]

    # ---- scores: q @ k^T without materializing a transpose ----
    s = jax.lax.dot_general(
        q_buf[...].astype(jnp.bfloat16), k.astype(jnp.bfloat16),
        (((1,), (1,)), ((), ())),
        preferred_element_type=jnp.float32)                         # (tq, tkv)

    # ---- online softmax (f32 math, v5e-safe) ----
    m_new = jnp.maximum(m_buf[...], jnp.max(s, axis=-1, keepdims=True))
    alpha = jnp.exp(m_buf[...] - m_new)
    p = jnp.exp(s - m_new)
    l_buf[...] = alpha * l_buf[...] + jnp.sum(p, axis=-1, keepdims=True)
    acc_buf[...] = alpha * acc_buf[...] + jnp.dot(
        p.astype(jnp.bfloat16), v.astype(jnp.bfloat16),
        preferred_element_type=jnp.float32)
    m_buf[...] = m_new

    # ---- finalize after the last kv tile ----
    @pl.when(kv == pl.num_programs(2) - 1)
    def _():
        inv_l = pl.reciprocal(l_buf[...], approx=True)              # EUP slot
        o_ref[0] = (acc_buf[...] * inv_l).astype(o_ref.dtype)


def _pick_tile(s, target):
    """Largest multiple-of-8 divisor of `s` that is <= target, else full `s`."""
    if s <= target:
        return s
    for t in range(target, 7, -1):
        if s % t == 0 and t % 8 == 0:
            return t
    return s


def attention_forward(query, keys, values, params, *, q_tile=256, kv_tile=256):
    """query/keys/values: [B, S, H] float32. params: PyTorch-convention weights."""
    B, S, H = query.shape
    tq = _pick_tile(S, q_tile)
    tkv = _pick_tile(S, kv_tile)
    nq = S // tq
    nkv = S // tkv

    # Pre-transpose ([out,in] -> [in,out]) and cast weights to bf16 once in the
    # wrapper so the kernel feeds the MXU directly (no per-step XLU transpose,
    # half the weight DMA bytes). Biases stay f32 (added post-accumulation).
    wq_t = params["wq"].T.astype(jnp.bfloat16)
    wk_t = params["wk"].T.astype(jnp.bfloat16)
    wv_t = params["wv"].T.astype(jnp.bfloat16)
    bq = params["bq"].astype(jnp.float32)
    bk = params["bk"].astype(jnp.float32)
    bv = params["bv"].astype(jnp.float32)

    scale = 1.0 / math.sqrt(H)

    q_spec = pl.BlockSpec((1, tq, H), lambda b, i, j: (b, i, 0))
    kv_spec = pl.BlockSpec((1, tkv, H), lambda b, i, j: (b, j, 0))
    w_spec = pl.BlockSpec((H, H), lambda b, i, j: (0, 0))
    b_spec = pl.BlockSpec((1, H), lambda b, i, j: (0, 0))

    kernel = functools.partial(_flash_attn_kernel, scale=scale)

    return pl.pallas_call(
        kernel,
        out_shape=jax.ShapeDtypeStruct((B, S, H), query.dtype),
        grid_spec=pltpu.PrefetchScalarGridSpec(
            num_scalar_prefetch=0,
            grid=(B, nq, nkv),
            in_specs=[q_spec, kv_spec, kv_spec,
                      w_spec, b_spec, w_spec, b_spec, w_spec, b_spec],
            out_specs=pl.BlockSpec((1, tq, H), lambda b, i, j: (b, i, 0)),
            scratch_shapes=[
                pltpu.VMEM((tq, H), jnp.float32),   # cached pre-scaled Q
                pltpu.VMEM((tq, 1), jnp.float32),   # running max (m)
                pltpu.VMEM((tq, 1), jnp.float32),   # running denom (l)
                pltpu.VMEM((tq, H), jnp.float32),   # output accumulator
            ]),
        compiler_params=pltpu.CompilerParams(
            dimension_semantics=("parallel", "parallel", "arbitrary"),
            # Explicit VMEM budget sized against v7x (64 MiB physical).
            vmem_limit_bytes=48 * 1024 * 1024),
    )(query, keys, values, wq_t, bq, wk_t, bk, wv_t, bv)


def init_params(hidden_dim, key):
    """Deterministic init mimicking nn.Linear's U(-1/sqrt(H), 1/sqrt(H))."""
    bound = 1.0 / math.sqrt(hidden_dim)
    ks = jax.random.split(key, 6)

    def u(k, shape):
        return jax.random.uniform(k, shape, jnp.float32, -bound, bound)

    return {
        "wq": u(ks[0], (hidden_dim, hidden_dim)),   # PyTorch [out, in]
        "bq": u(ks[1], (1, hidden_dim)),
        "wk": u(ks[2], (hidden_dim, hidden_dim)),
        "bk": u(ks[3], (1, hidden_dim)),
        "wv": u(ks[4], (hidden_dim, hidden_dim)),
        "bv": u(ks[5], (1, hidden_dim)),
    }


def attention_reference(query, keys, values, params):
    """Pure-JAX f32 reference for correctness checking."""
    q = query @ params["wq"].T + params["bq"]
    k = keys @ params["wk"].T + params["bk"]
    v = values @ params["wv"].T + params["bv"]
    scores = jnp.einsum("bqh,bkh->bqk", q, k) / math.sqrt(k.shape[-1])
    attn = jax.nn.softmax(scores, axis=-1)
    return jnp.einsum("bqk,bkh->bqh", attn, v)


if __name__ == "__main__":
    B, S, H = 2, 8, 32
    root = jax.random.PRNGKey(0)
    k_param, k_q, k_k, k_v = jax.random.split(root, 4)

    params = init_params(H, k_param)
    query = jax.random.normal(k_q, (B, S, H), jnp.float32)
    keys = jax.random.normal(k_k, (B, S, H), jnp.float32)
    values = jax.random.normal(k_v, (B, S, H), jnp.float32)

    out = attention_forward(query, keys, values, params)
    out = jax.block_until_ready(out)

    ref = attention_reference(query, keys, values, params)
    assert out.shape == (B, S, H)
    # bf16 MXU operands + approx reciprocal -> loosened tolerance vs f32 ref.
    assert jnp.allclose(out, ref, atol=5e-2, rtol=5e-2), "mismatch vs reference"

    print("KERNEL_OK")
</pallas_src>

<mosaic_0001>
module attributes {stable_mosaic.version = 11 : i64} {
  func.func @_flash_attn_kernel(%arg0: i32, %arg1: i32, %arg2: i32, %arg3: memref<1x8x32xf32, #tpu.memory_space<vmem>>, %arg4: memref<1x8x32xf32, #tpu.memory_space<vmem>>, %arg5: memref<1x8x32xf32, #tpu.memory_space<vmem>>, %arg6: memref<32x32xbf16, #tpu.memory_space<vmem>>, %arg7: memref<1x32xf32, #tpu.memory_space<vmem>>, %arg8: memref<32x32xbf16, #tpu.memory_space<vmem>>, %arg9: memref<1x32xf32, #tpu.memory_space<vmem>>, %arg10: memref<32x32xbf16, #tpu.memory_space<vmem>>, %arg11: memref<1x32xf32, #tpu.memory_space<vmem>>, %arg12: memref<1x8x32xf32, #tpu.memory_space<vmem>>, %arg13: memref<8x32xf32, #tpu.memory_space<vmem>>, %arg14: memref<8x1xf32, #tpu.memory_space<vmem>>, %arg15: memref<8x1xf32, #tpu.memory_space<vmem>>, %arg16: memref<8x32xf32, #tpu.memory_space<vmem>>) attributes {dimension_semantics = [#tpu.dimension_semantics<parallel>, #tpu.dimension_semantics<parallel>, #tpu.dimension_semantics<arbitrary>], iteration_bounds = array<i64: 2, 1, 1>, scalar_prefetch = 0 : i64, scratch_operands = 4 : i64, tpu.core_type = #tpu.core_type<tc>, window_params = [{transform_indices = @transform_0, window_bounds = array<i64: 1, 8, 32>}, {transform_indices = @transform_1, window_bounds = array<i64: 1, 8, 32>}, {transform_indices = @transform_2, window_bounds = array<i64: 1, 8, 32>}, {pipeline_mode = #tpu.pipeline_mode<synchronous>, transform_indices = @transform_3, window_bounds = array<i64: 32, 32>}, {pipeline_mode = #tpu.pipeline_mode<synchronous>, transform_indices = @transform_4, window_bounds = array<i64: 1, 32>}, {pipeline_mode = #tpu.pipeline_mode<synchronous>, transform_indices = @transform_5, window_bounds = array<i64: 32, 32>}, {pipeline_mode = #tpu.pipeline_mode<synchronous>, transform_indices = @transform_6, window_bounds = array<i64: 1, 32>}, {pipeline_mode = #tpu.pipeline_mode<synchronous>, transform_indices = @transform_7, window_bounds = array<i64: 32, 32>}, {pipeline_mode = #tpu.pipeline_mode<synchronous>, transform_indices = @transform_8, window_bounds = array<i64: 1, 32>}, {transform_indices = @transform_9, window_bounds = array<i64: 1, 8, 32>}]} {
    %c0_i32 = arith.constant 0 : i32
    %0 = arith.cmpi eq, %arg2, %c0_i32 : i32
    %1 = arith.extui %0 : i1 to i32
    %c0_i32_0 = arith.constant 0 : i32
    %2 = arith.cmpi ne, %1, %c0_i32_0 : i32
    scf.if %2 {
      %c0_37 = arith.constant 0 : index
      %c0_38 = arith.constant 0 : index
      %c0_39 = arith.constant 0 : index
      %51 = vector.load %arg3[%c0_37, %c0_38, %c0_39] : memref<1x8x32xf32, #tpu.memory_space<vmem>>, vector<1x8x32xf32>
      %52 = vector.shape_cast %51 : vector<1x8x32xf32> to vector<8x32xf32>
      %53 = arith.truncf %52 : vector<8x32xf32> to vector<8x32xbf16>
      %c0_40 = arith.constant 0 : index
      %c0_41 = arith.constant 0 : index
      %54 = vector.load %arg6[%c0_40, %c0_41] : memref<32x32xbf16, #tpu.memory_space<vmem>>, vector<32x32xbf16>
      %cst_42 = arith.constant dense<0.000000e+00> : vector<8x32xf32>
      %55 = tpu.matmul %53, %54, %cst_42 {dimension_numbers = #tpu.dot_dimension_numbers<[1], [0], [0], [1], [0, 0, 1, 1], [], []>} : vector<8x32xbf16>, vector<32x32xbf16>, vector<8x32xf32> -> vector<8x32xf32>
      %c0_43 = arith.constant 0 : index
      %c0_44 = arith.constant 0 : index
      %56 = vector.load %arg7[%c0_43, %c0_44] : memref<1x32xf32, #tpu.memory_space<vmem>>, vector<1x32xf32>
      %57 = vector.broadcast %56 : vector<1x32xf32> to vector<8x32xf32>
      %58 = arith.addf %55, %57 : vector<8x32xf32>
      %cst_45 = arith.constant 0.176776692 : f32
      %59 = vector.broadcast %cst_45 : f32 to vector<8x32xf32>
      %60 = arith.mulf %58, %59 : vector<8x32xf32>
      %c0_46 = arith.constant 0 : index
      %c0_47 = arith.constant 0 : index
      %61 = vector.load %arg13[%c0_46, %c0_47] : memref<8x32xf32, #tpu.memory_space<vmem>>, vector<8x32xf32>
      tpu.vector_store %arg13[%c0_46, %c0_47], %60 {strides = array<i32>} : memref<8x32xf32, #tpu.memory_space<vmem>>, vector<8x32xf32>,
      %cst_48 = arith.constant 0xFF800000 : f32
      %62 = vector.broadcast %cst_48 : f32 to vector<8x1xf32>
      %c0_49 = arith.constant 0 : index
      %c0_50 = arith.constant 0 : index
      %63 = vector.load %arg14[%c0_49, %c0_50] : memref<8x1xf32, #tpu.memory_space<vmem>>, vector<8x1xf32>
      tpu.vector_store %arg14[%c0_49, %c0_50], %62 {strides = array<i32>} : memref<8x1xf32, #tpu.memory_space<vmem>>, vector<8x1xf32>,
      %cst_51 = arith.constant 0.000000e+00 : f32
      %64 = vector.broadcast %cst_51 : f32 to vector<8x1xf32>
      %c0_52 = arith.constant 0 : index
      %c0_53 = arith.constant 0 : index
      %65 = vector.load %arg15[%c0_52, %c0_53] : memref<8x1xf32, #tpu.memory_space<vmem>>, vector<8x1xf32>
      tpu.vector_store %arg15[%c0_52, %c0_53], %64 {strides = array<i32>} : memref<8x1xf32, #tpu.memory_space<vmem>>, vector<8x1xf32>,
      %cst_54 = arith.constant 0.000000e+00 : f32
      %66 = vector.broadcast %cst_54 : f32 to vector<8x32xf32>
      %c0_55 = arith.constant 0 : index
      %c0_56 = arith.constant 0 : index
      %67 = vector.load %arg16[%c0_55, %c0_56] : memref<8x32xf32, #tpu.memory_space<vmem>>, vector<8x32xf32>
      tpu.vector_store %arg16[%c0_55, %c0_56], %66 {strides = array<i32>} : memref<8x32xf32, #tpu.memory_space<vmem>>, vector<8x32xf32>,
    } else {
    }
    %c0 = arith.constant 0 : index
    %c0_1 = arith.constant 0 : index
    %c0_2 = arith.constant 0 : index
    %3 = vector.load %arg4[%c0, %c0_1, %c0_2] : memref<1x8x32xf32, #tpu.memory_space<vmem>>, vector<1x8x32xf32>
    %4 = vector.shape_cast %3 : vector<1x8x32xf32> to vector<8x32xf32>
    %5 = arith.truncf %4 : vector<8x32xf32> to vector<8x32xbf16>
    %c0_3 = arith.constant 0 : index
    %c0_4 = arith.constant 0 : index
    %c0_5 = arith.constant 0 : index
    %6 = vector.load %arg5[%c0_3, %c0_4, %c0_5] : memref<1x8x32xf32, #tpu.memory_space<vmem>>, vector<1x8x32xf32>
    %7 = vector.shape_cast %6 : vector<1x8x32xf32> to vector<8x32xf32>
    %8 = arith.truncf %7 : vector<8x32xf32> to vector<8x32xbf16>
    %c0_6 = arith.constant 0 : index
    %c0_7 = arith.constant 0 : index
    %9 = vector.load %arg8[%c0_6, %c0_7] : memref<32x32xbf16, #tpu.memory_space<vmem>>, vector<32x32xbf16>
    %cst = arith.constant dense<0.000000e+00> : vector<8x32xf32>
    %10 = tpu.matmul %5, %9, %cst {dimension_numbers = #tpu.dot_dimension_numbers<[1], [0], [0], [1], [0, 0, 1, 1], [], []>} : vector<8x32xbf16>, vector<32x32xbf16>, vector<8x32xf32> -> vector<8x32xf32>
    %c0_8 = arith.constant 0 : index
    %c0_9 = arith.constant 0 : index
    %11 = vector.load %arg9[%c0_8, %c0_9] : memref<1x32xf32, #tpu.memory_space<vmem>>, vector<1x32xf32>
    %12 = vector.broadcast %11 : vector<1x32xf32> to vector<8x32xf32>
    %13 = arith.addf %10, %12 : vector<8x32xf32>
    %c0_10 = arith.constant 0 : index
    %c0_11 = arith.constant 0 : index
    %14 = vector.load %arg10[%c0_10, %c0_11] : memref<32x32xbf16, #tpu.memory_space<vmem>>, vector<32x32xbf16>
    %cst_12 = arith.constant dense<0.000000e+00> : vector<8x32xf32>
    %15 = tpu.matmul %8, %14, %cst_12 {dimension_numbers = #tpu.dot_dimension_numbers<[1], [0], [0], [1], [0, 0, 1, 1], [], []>} : vector<8x32xbf16>, vector<32x32xbf16>, vector<8x32xf32> -> vector<8x32xf32>
    %c0_13 = arith.constant 0 : index
    %c0_14 = arith.constant 0 : index
    %16 = vector.load %arg11[%c0_13, %c0_14] : memref<1x32xf32, #tpu.memory_space<vmem>>, vector<1x32xf32>
    %17 = vector.broadcast %16 : vector<1x32xf32> to vector<8x32xf32>
    %18 = arith.addf %15, %17 : vector<8x32xf32>
    %c0_15 = arith.constant 0 : index
    %c0_16 = arith.constant 0 : index
    %19 = vector.load %arg13[%c0_15, %c0_16] : memref<8x32xf32, #tpu.memory_space<vmem>>, vector<8x32xf32>
    %20 = arith.truncf %19 : vector<8x32xf32> to vector<8x32xbf16>
    %21 = arith.truncf %13 : vector<8x32xf32> to vector<8x32xbf16>
    %cst_17 = arith.constant dense<0.000000e+00> : vector<8x8xf32>
    %22 = tpu.matmul %20, %21, %cst_17 {dimension_numbers = #tpu.dot_dimension_numbers<[1], [1], [0], [0], [0, 0, 1, 0], [], []>} : vector<8x32xbf16>, vector<8x32xbf16>, vector<8x8xf32> -> vector<8x8xf32>
    %c0_18 = arith.constant 0 : index
    %c0_19 = arith.constant 0 : index
    %23 = vector.load %arg14[%c0_18, %c0_19] : memref<8x1xf32, #tpu.memory_space<vmem>>, vector<8x1xf32>
    %cst_20 = arith.constant dense<0xFF800000> : vector<8xf32>
    %24 = vector.multi_reduction <maximumf>, %22, %cst_20 [1] : vector<8x8xf32> to vector<8xf32>
    %25 = vector.shape_cast %24 : vector<8xf32> to vector<8x1xf32>
    %26 = arith.maximumf %23, %25 : vector<8x1xf32>
    %c0_21 = arith.constant 0 : index
    %c0_22 = arith.constant 0 : index
    %27 = vector.load %arg14[%c0_21, %c0_22] : memref<8x1xf32, #tpu.memory_space<vmem>>, vector<8x1xf32>
    %28 = arith.subf %27, %26 : vector<8x1xf32>
    %29 = math.exp %28 : vector<8x1xf32>
    %30 = vector.broadcast %26 : vector<8x1xf32> to vector<8x8xf32>
    %31 = arith.subf %22, %30 : vector<8x8xf32>
    %32 = math.exp %31 : vector<8x8xf32>
    %c0_23 = arith.constant 0 : index
    %c0_24 = arith.constant 0 : index
    %33 = vector.load %arg15[%c0_23, %c0_24] : memref<8x1xf32, #tpu.memory_space<vmem>>, vector<8x1xf32>
    %34 = arith.mulf %29, %33 : vector<8x1xf32>
    %cst_25 = arith.constant dense<0.000000e+00> : vector<8xf32>
    %35 = vector.multi_reduction <add>, %32, %cst_25 [1] : vector<8x8xf32> to vector<8xf32>
    %36 = vector.shape_cast %35 : vector<8xf32> to vector<8x1xf32>
    %37 = arith.addf %34, %36 : vector<8x1xf32>
    %c0_26 = arith.constant 0 : index
    %c0_27 = arith.constant 0 : index
    %38 = vector.load %arg15[%c0_26, %c0_27] : memref<8x1xf32, #tpu.memory_space<vmem>>, vector<8x1xf32>
    tpu.vector_store %arg15[%c0_26, %c0_27], %37 {strides = array<i32>} : memref<8x1xf32, #tpu.memory_space<vmem>>, vector<8x1xf32>,
    %c0_28 = arith.constant 0 : index
    %c0_29 = arith.constant 0 : index
    %39 = vector.load %arg16[%c0_28, %c0_29] : memref<8x32xf32, #tpu.memory_space<vmem>>, vector<8x32xf32>
    %40 = vector.broadcast %29 : vector<8x1xf32> to vector<8x32xf32>
    %41 = arith.mulf %40, %39 : vector<8x32xf32>
    %42 = arith.truncf %32 : vector<8x8xf32> to vector<8x8xbf16>
    %43 = arith.truncf %18 : vector<8x32xf32> to vector<8x32xbf16>
    %cst_30 = arith.constant dense<0.000000e+00> : vector<8x32xf32>
    %44 = tpu.matmul %42, %43, %cst_30 {dimension_numbers = #tpu.dot_dimension_numbers<[1], [0], [0], [1], [0, 0, 1, 1], [], []>} : vector<8x8xbf16>, vector<8x32xbf16>, vector<8x32xf32> -> vector<8x32xf32>
    %45 = arith.addf %41, %44 : vector<8x32xf32>
    %c0_31 = arith.constant 0 : index
    %c0_32 = arith.constant 0 : index
    %46 = vector.load %arg16[%c0_31, %c0_32] : memref<8x32xf32, #tpu.memory_space<vmem>>, vector<8x32xf32>
    tpu.vector_store %arg16[%c0_31, %c0_32], %45 {strides = array<i32>} : memref<8x32xf32, #tpu.memory_space<vmem>>, vector<8x32xf32>,
    %c0_33 = arith.constant 0 : index
    %c0_34 = arith.constant 0 : index
    %47 = vector.load %arg14[%c0_33, %c0_34] : memref<8x1xf32, #tpu.memory_space<vmem>>, vector<8x1xf32>
    tpu.vector_store %arg14[%c0_33, %c0_34], %26 {strides = array<i32>} : memref<8x1xf32, #tpu.memory_space<vmem>>, vector<8x1xf32>,
    %c0_i32_35 = arith.constant 0 : i32
    %48 = arith.cmpi eq, %arg2, %c0_i32_35 : i32
    %49 = arith.extui %48 : i1 to i32
    %c0_i32_36 = arith.constant 0 : i32
    %50 = arith.cmpi ne, %49, %c0_i32_36 : i32
    scf.if %50 {
      %c0_37 = arith.constant 0 : index
      %c0_38 = arith.constant 0 : index
      %51 = vector.load %arg15[%c0_37, %c0_38] : memref<8x1xf32, #tpu.memory_space<vmem>>, vector<8x1xf32>
      %52 = tpu.reciprocal %51 {approx = true} : vector<8x1xf32> -> vector<8x1xf32>
      %c0_39 = arith.constant 0 : index
      %c0_40 = arith.constant 0 : index
      %53 = vector.load %arg16[%c0_39, %c0_40] : memref<8x32xf32, #tpu.memory_space<vmem>>, vector<8x32xf32>
      %54 = vector.broadcast %52 : vector<8x1xf32> to vector<8x32xf32>
      %55 = arith.mulf %53, %54 : vector<8x32xf32>
      %c0_41 = arith.constant 0 : index
      %c0_42 = arith.constant 0 : index
      %c0_43 = arith.constant 0 : index
      %56 = vector.load %arg12[%c0_41, %c0_42, %c0_43] : memref<1x8x32xf32, #tpu.memory_space<vmem>>, vector<1x8x32xf32>
      %57 = vector.shape_cast %56 : vector<1x8x32xf32> to vector<8x32xf32>
      %58 = vector.shape_cast %55 : vector<8x32xf32> to vector<1x8x32xf32>
      tpu.vector_store %arg12[%c0_41, %c0_42, %c0_43], %58 {strides = array<i32>} : memref<1x8x32xf32, #tpu.memory_space<vmem>>, vector<1x8x32xf32>,
    } else {
    }
    return
  }
  func.func @transform_0(%arg0: i32, %arg1: i32, %arg2: i32) -> (i32, i32, i32) {
    %c0_i32 = arith.constant 0 : i32
    %c0_i32_0 = arith.constant 0 : i32
    return %arg0, %arg1, %c0_i32 : i32, i32, i32
  }
  func.func @transform_1(%arg0: i32, %arg1: i32, %arg2: i32) -> (i32, i32, i32) {
    %c0_i32 = arith.constant 0 : i32
    %c0_i32_0 = arith.constant 0 : i32
    return %arg0, %arg2, %c0_i32 : i32, i32, i32
  }
  func.func @transform_2(%arg0: i32, %arg1: i32, %arg2: i32) -> (i32, i32, i32) {
    %c0_i32 = arith.constant 0 : i32
    %c0_i32_0 = arith.constant 0 : i32
    return %arg0, %arg2, %c0_i32 : i32, i32, i32
  }
  func.func @transform_3(%arg0: i32, %arg1: i32, %arg2: i32) -> (i32, i32) {
    %c0_i32 = arith.constant 0 : i32
    %c0_i32_0 = arith.constant 0 : i32
    %c0_i32_1 = arith.constant 0 : i32
    return %c0_i32, %c0_i32_0 : i32, i32
  }
  func.func @transform_4(%arg0: i32, %arg1: i32, %arg2: i32) -> (i32, i32) {
    %c0_i32 = arith.constant 0 : i32
    %c0_i32_0 = arith.constant 0 : i32
    %c0_i32_1 = arith.constant 0 : i32
    return %c0_i32, %c0_i32_0 : i32, i32
  }
  func.func @transform_5(%arg0: i32, %arg1: i32, %arg2: i32) -> (i32, i32) {
    %c0_i32 = arith.constant 0 : i32
    %c0_i32_0 = arith.constant 0 : i32
    %c0_i32_1 = arith.constant 0 : i32
    return %c0_i32, %c0_i32_0 : i32, i32
  }
  func.func @transform_6(%arg0: i32, %arg1: i32, %arg2: i32) -> (i32, i32) {
    %c0_i32 = arith.constant 0 : i32
    %c0_i32_0 = arith.constant 0 : i32
    %c0_i32_1 = arith.constant 0 : i32
    return %c0_i32, %c0_i32_0 : i32, i32
  }
  func.func @transform_7(%arg0: i32, %arg1: i32, %arg2: i32) -> (i32, i32) {
    %c0_i32 = arith.constant 0 : i32
    %c0_i32_0 = arith.constant 0 : i32
    %c0_i32_1 = arith.constant 0 : i32
    return %c0_i32, %c0_i32_0 : i32, i32
  }
  func.func @transform_8(%arg0: i32, %arg1: i32, %arg2: i32) -> (i32, i32) {
    %c0_i32 = arith.constant 0 : i32
    %c0_i32_0 = arith.constant 0 : i32
    %c0_i32_1 = arith.constant 0 : i32
    return %c0_i32, %c0_i32_0 : i32, i32
  }
  func.func @transform_9(%arg0: i32, %arg1: i32, %arg2: i32) -> (i32, i32, i32) {
    %c0_i32 = arith.constant 0 : i32
    %c0_i32_0 = arith.constant 0 : i32
    return %arg0, %arg1, %c0_i32 : i32, i32, i32
  }
}

</mosaic_0001>

<bundles_post_ra>
// kernel: tpu_custom_call.1
= control target key start
LH: loop header
LB: loop body
LE: loop exit
PB: predicated region body
PF: predicated region fallthrough
CT: control target
= control target key end

     0   :  { %s1861_s0 = inlined_call_operand.hbm [shape: f32[2,8,32], index: 0, kind: input, shape index: {}]   ;;  %s1862_s1 = inlined_call_operand.hbm [shape: f32[2,8,32], index: 1, kind: input, shape index: {}]   ;;  %s1863_s2 = inlined_call_operand.hbm [shape: f32[2,8,32], index: 2, kind: input, shape index: {}]   ;;  %s1864_s3 = inlined_call_operand.hbm [shape: bf16[32,32], index: 3, kind: input, shape index: {}]   ;;  %s1865_s4 = inlined_call_operand.vmem [shape: f32[1,32], index: 4, kind: input, shape index: {}]   ;;  %s1866_s5 = inlined_call_operand.vmem [shape: bf16[32,32], index: 5, kind: input, shape index: {}]   ;;  %s1867_s6 = inlined_call_operand.vmem [shape: f32[1,32], index: 6, kind: input, shape index: {}]   ;;  %s1868_s7 = inlined_call_operand.hbm [shape: bf16[32,32], index: 7, kind: input, shape index: {}]   ;;  %s1869_s8 = inlined_call_operand.vmem [shape: f32[1,32], index: 8, kind: input, shape index: {}]   ;;  %s1870_s9 = inlined_call_operand.hbm [shape: f32[2,8,32], index: 9, kind: output, shape index: {}]  }
   0x1   :  { %1892 = sst [smem:[#allocation26_spill]] %s1862_s1 }
   0x2   :  { %1893 = sst [smem:[#allocation27_spill]] %s1864_s3 }
   0x3   :  { %1894 = sst [smem:[#allocation28_spill]] %s1868_s7 }
   0x4   :  { %1895 = sst [smem:[#allocation29_spill]] %s1870_s9 }
   0x5   :  { %14 = vsyncpa [#allocation7], 0 }
   0x6   :  { %16 = vsyncpa [#allocation7 + $0x1], 0 }
   0x7   :  { %17 = vsyncpa [#allocation10], 0 }
   0x8   :  { %19 = vsyncpa [#allocation10 + $0x1], 0 }
   0x9   :  { %20 = vsyncpa [#allocation13], 0 }
   0xa   :  { %21 = vsyncpa [#allocation8], 0 }
   0xb   :  { %23 = vsyncpa [#allocation8 + $0x1], 0  ;;  %s1502_s30 = smov 0   ;;  %s1504_s10 = smov 0  }
   0xc   :  { %s1506_s11 = smov 0   ;;  %s1508_s12 = smov 0  }
   0xd   :  { %s1510_s13 = smov 0   ;;  %s1512_s14 = smov 0  }
   0xe LB: > { %1896 = sst [smem:[#allocation20_spill]] %s1418_s30  ;;  %s1533_s15 = sadd.s32 4294967295, %s1438_s14   ;;  %s1438_s14 = sphi %s1512_s14, %s29_s14   ;;  %s1434_s13 = sphi %s1510_s13, %s1935_s13   ;;  %s1430_s12 = sphi %s1508_s12, %s1934_s12   ;;  %s1426_s11 = sphi %s1506_s11, %s1938_s11   ;;  %s1422_s10 = sphi %s1504_s10, %s1937_s10   ;;  %s1418_s30 = sphi %s1502_s30, %s1936_s30  }
   0xf   : > { %1897 = sst [smem:[#allocation21_spill]] %s1434_s13  ;;  %s1004_s16 = sadd.s32 4294967294, %s1438_s14  }
  0x10   : > { %1898 = sst [smem:[#allocation22_spill]] %s1438_s14  ;;  %p70_p0 = scmp.ne.s32.totalorder %s1422_s10, %s1418_s30 }
  0x11   : > { %p1871_p1 = scmp.eq.s32.totalorder %s1533_s15, 0  ;;  %p284_p3 = scmp.eq.s32.totalorder %s1004_s16, 1 }
  0x12   : > { %p1005_p5 = scmp.ge.s32.totalorder %s1438_s14, 1  ;;  %p291_p7 = scmp.lt.s32.totalorder %s1438_s14, 3 }
  0x13   : > { %p1542_p4 = por %p1871_p1, %p70_p0  ;;  %p1547_p6 = por %p284_p3, %p70_p0 }
  0x14   : > { %p1552_p8 = pnand %p1005_p5, %p291_p7  ;;  %s1440_s20 = smov [#allocation12]  }
  0x15   : > { %s1899_s17 = scalar_select %p1542_p4, 1, 0 }
  0x16   : > { %s1900_s18 = scalar_select %p1547_p6, 1, 0 }
  0x17   : > { %s1902_s19 = scalar_select %p1552_p8, 1, 0 }
  0x18   : > { %1901 = sst [smem:[#allocation23_spill]] %s1900_s18  ;;  %s303_s21 = sshll.u32 %s1440_s20, 4  ;;  %s304_s21 = int_to_ptr.vmem [resolvable:$true] %s303_s21 }
  0x19   : > { %p1105_p9 = pneg %p1552_p8  ;;  %s48_s23 = sadd.s32 1, %s1434_s13 }
  0x1a   : > { %s1904_s3 = sld [smem:[#allocation27_spill]] }
  0x1b   : > { %p1561_p11 = pnand %p1105_p9, %p1871_p1 }
  0x1d   : > { %s1903_s22 = scalar_select %p1561_p11, 1, 0 }
  0x1e   : > { %p1884_p13 = pneg %p1561_p11 }
  0x20   : > { %s1202_s26 = scalar_lea.hbm %s1904_s3, 256 }
  0x21   : > { %p1203_p12 = scmp.ne.s32.totalorder %s1904_s3, %s1202_s26  ;;  %p1209_p5 = scmp.lt.u32.totalorder %s1202_s26, %s1904_s3 }
  0x23   : > { %p1205_p0 = pnand %p1884_p13, %p1203_p12 }
  0x25   : > { %p1206_p3 = pneg %p1205_p0 }
  0x27   : > { %p1211_p7 = pnand %p1209_p5, %p1206_p3 }
  0x29   : > { %1214 = shalt.err (!%p1211_p7)
}
  0x2a   : > { %s1215_s20 = scalar_lea.vmem %s304_s21, 256  ;;  %p1223_p2 = scmp.lt.s32.totalorder %s304_s21, %s304_s21 }
  0x2b   : > { %p1216_p9 = scmp.ne.s32.totalorder %s304_s21, %s1215_s20  ;;  %p1224_p6 = scmp.lt.s32.totalorder %s1215_s20, %s1215_s20 }
  0x2d   : > { %p1218_p10 = pnand %p1216_p9, %p1884_p13  ;;  %p1225_p4 = por %p1224_p6, %p1223_p2 }
  0x2f   : > { %p1219_p1 = pneg %p1218_p10 }
  0x31   : > { %p1226_p8 = pnand %p1225_p4, %p1219_p1 }
  0x33   : > { %1229 = shalt.err (!%p1226_p8)
}
  0x34   : > { %s1874_s24 = smov 64   ;;  %s1875_s25 = smov 4  }
  0x35   : > { %1108 = dma.hbm_to_vmem [thread:$0]  (!%p1561_p11), %s1904_s3, 256, %s304_s21, [#allocation13], %s1874_s24, %s1874_s24, %s1875_s25  }
  0x36   : > { %p50_p1 = scmp.ge.s32.totalorder %s48_s23, 2  ;;  %s57_s28 = sadd.s32 1, %s1426_s11 }
  0x37   : > { %p64_p2 = scmp.ne.s32.totalorder %s1426_s11, %s1422_s10  ;;  %p65_p4 = scmp.eq.s32.totalorder %s1438_s14, 0 }
  0x38   : > { %s1940_s23 = smov (%p50_p1, %s48_s23), 0  ;;  %p1906_p8 = scmp.eq.s32.totalorder %s1533_s15, 1 }
  0x39   : > { %1905 = sst [smem:[#allocation24_spill]] %s1940_s23  ;;  %p66_p6 = por %p65_p4, %p64_p2 }
  0x3a   : > { %p1599_p10 = por %p1906_p8, %p64_p2  ;;  %s52_s16 = ssub.s32 %s1434_s13, %s1940_s23 }
  0x3b   : > { %p1128_p12 = scmp.lt.s32.totalorder %s1438_s14, 2  ;;  %p55_p0 = scmp.eq.s32.totalorder %s52_s16, 0 }
  0x3c   : > { %s1907_s29 = scalar_select %p1599_p10, 1, 0 }
  0x3d   : > { %s1877_s20 = sand.u32 1, %s1426_s11   ;;  %s1612_s26 = sshll.u32 %s1434_s13, 7 }
  0x3e   : > { %s1609_s21 = sshll.u32 %s1877_s20, 3  ;;  %p1617_p3 = pnand %p1128_p12, %p66_p6 }
  0x3f   : > { %s1615_s27 = scalar_select %p55_p0, %s1426_s11, %s57_s28  }
  0x40   : > { %s1909_s24 = scalar_select %p1617_p3, 1, 0 }
  0x41   : > { %1908 = sst [smem:[#allocation25_spill]] %s1615_s27  ;;  %s361_s25 = sand.u32 1, %s1438_s14  }
  0x42   : > { %s1910_s1 = sld [smem:[#allocation26_spill]]  ;;  %s365_s20 = scalar_lea.vmem [#allocation9], %s1609_s21 }
  0x43   : > { %s373_s13 = sshll.u32 %s365_s20, 4  ;;  %s1443_s28 = smov [#allocation14]   ;;  %s1629_s13 = int_to_ptr.vmem [resolvable:$true] %s373_s13 }
  0x44   : > { %s1631_s27 = sshll.u32 %s1443_s28, 4  ;;  %s1633_s18 = scalar_lea.sflag [#allocation10], %s361_s25  ;;  %s326_s27 = int_to_ptr.vmem [resolvable:$true] %s1631_s27 }
  0x45   : > { %p1639_p7 = pneg %p1617_p3 }
  0x47   : > { %s1911_s3 = scalar_select %p1639_p7, 1, 0 }
  0x48   : > { %s1626_s16 = scalar_lea.hbm %s1910_s1, %s1612_s26  ;;  %s1235_s14 = scalar_lea.hbm %s1910_s1, 256 }
  0x49   : > { %s1230_s30 = scalar_lea.hbm %s1626_s16, 128  ;;  %p1236_p2 = scmp.lt.u32.totalorder %s1626_s16, %s1910_s1 }
  0x4a   : > { %p1231_p5 = scmp.ne.s32.totalorder %s1626_s16, %s1230_s30  ;;  %p1237_p4 = scmp.lt.u32.totalorder %s1235_s14, %s1230_s30 }
  0x4b   : > { %p1239_p8 = scmp.lt.u32.totalorder %s1230_s30, %s1626_s16 }
  0x4c   : > { %p1233_p9 = pnand %p1639_p7, %p1231_p5  ;;  %p1238_p6 = por %p1237_p4, %p1236_p2 }
  0x4e   : > { %p1234_p1 = pneg %p1233_p9  ;;  %p1240_p12 = por %p1239_p8, %p1238_p6 }
  0x50   : > { %p1241_p0 = pnand %p1240_p12, %p1234_p1 }
  0x52   : > { %1244 = shalt.err (!%p1241_p0)
}
  0x53   : > { %s1245_s25 = scalar_lea.vmem %s1629_s13, 128  ;;  %s1444_s23 = smov [#allocation9]  }
  0x54   : > { %p1246_p5 = scmp.ne.s32.totalorder %s1629_s13, %s1245_s25  ;;  %s1250_s20 = sshll.u32 %s1444_s23, 4  ;;  %s1251_s20 = int_to_ptr.vmem [resolvable:$false] %s1250_s20 }
  0x55   : > { %s1252_s9 = scalar_lea.vmem %s1251_s20, 256  ;;  %p1253_p10 = scmp.lt.s32.totalorder %s1629_s13, %s1251_s20 }
  0x56   : > { %p1248_p9 = pnand %p1246_p5, %p1639_p7  ;;  %p1254_p11 = scmp.lt.s32.totalorder %s1252_s9, %s1245_s25 }
  0x58   : > { %p1249_p13 = pneg %p1248_p9  ;;  %p1255_p2 = por %p1254_p11, %p1253_p10 }
  0x5a   : > { %p1256_p4 = pnand %p1255_p2, %p1249_p13 }
  0x5c   : > { %1259 = shalt.err (!%p1256_p4)
}
  0x5d   : > { %1118 = dma.hbm_to_vmem [thread:$0]  (!%p1617_p3), %s1626_s16, 128, %s1629_s13, %s1633_s18  }
  0x5e   : > { %s1912_s7 = sld [smem:[#allocation28_spill]]  ;;  %p1913_p11 = scmp.ne.s32.totalorder %s1903_s22, 0 }
  0x60   : > { %p1914_p13 = pneg %p1913_p11 }
  0x64   : > { %s1260_s28 = scalar_lea.hbm %s1912_s7, 256 }
  0x65   : > { %p1261_p1 = scmp.ne.s32.totalorder %s1912_s7, %s1260_s28  ;;  %p1267_p8 = scmp.lt.u32.totalorder %s1260_s28, %s1912_s7 }
  0x67   : > { %p1263_p10 = pnand %p1261_p1, %p1914_p13 }
  0x69   : > { %p1264_p6 = pneg %p1263_p10 }
  0x6b   : > { %p1269_p12 = pnand %p1267_p8, %p1264_p6 }
  0x6d   : > { %1272 = shalt.err (!%p1269_p12)
}
  0x6e   : > { %s1273_s13 = scalar_lea.vmem %s326_s27, 256  ;;  %p1915_p5 = pmov %p1914_p13 }
  0x6f   : > { %p1274_p0 = scmp.ne.s32.totalorder %s326_s27, %s1273_s13  ;;  %p1281_p4 = scmp.lt.s32.totalorder %s326_s27, %s326_s27 }
  0x70   : > { %p1282_p3 = scmp.lt.s32.totalorder %s1273_s13, %s1273_s13 }
  0x71   : > { %p1276_p9 = pnand %p1274_p0, %p1915_p5 }
  0x72   : > { %p1283_p7 = por %p1282_p3, %p1281_p4 }
  0x73   : > { %p1277_p2 = pneg %p1276_p9 }
  0x75   : > { %p1284_p1 = pnand %p1283_p7, %p1277_p2 }
  0x77   : > { %1287 = shalt.err (!%p1284_p1)
}
  0x78   : > { %s1916_s1 = smov 4   ;;  %s1917_s16 = smov 64  }
  0x79   : > { %1111 = dma.hbm_to_vmem [thread:$0]  (!%p1913_p11), %s1912_s7, 256, %s326_s27, [#allocation13], %s1917_s16, %s1917_s16, %s1916_s1  }
  0x7a   : > { %s1691_s23 = scalar_lea.hbm %s1861_s0, %s1612_s26  ;;  %s346_s22 = scalar_lea.vmem [#allocation6], %s1609_s21 }
  0x7b   : > { %s354_s25 = sshll.u32 %s346_s22, 4  ;;  %s1700_s9 = scalar_lea.hbm %s1863_s2, %s1612_s26  ;;  %s1694_s25 = int_to_ptr.vmem [resolvable:$true] %s354_s25 }
  0x7c   : > { %s1918_s30 = sand.u32 1, %s1426_s11   ;;  %s1288_s1 = scalar_lea.hbm %s1691_s23, 128 }
  0x7d   : > { %s343_s27 = scalar_lea.sflag [#allocation7], %s1918_s30  ;;  %p1289_p3 = scmp.ne.s32.totalorder %s1691_s23, %s1288_s1 }
  0x7e   : > { %p1919_p7 = scmp.ne.s32.totalorder %s1911_s3, 0  ;;  %s1293_s28 = scalar_lea.hbm %s1861_s0, 256 }
  0x7f   : > { %p1294_p10 = scmp.lt.u32.totalorder %s1691_s23, %s1861_s0  ;;  %p1295_p6 = scmp.lt.u32.totalorder %s1293_s28, %s1288_s1 }
  0x80   : > { %p1291_p11 = pnand %p1289_p3, %p1919_p7  ;;  %p1297_p12 = scmp.lt.u32.totalorder %s1288_s1, %s1691_s23 }
  0x81   : > { %p1296_p8 = por %p1295_p6, %p1294_p10 }
  0x82   : > { %p1292_p13 = pneg %p1291_p11 }
  0x83   : > { %p1298_p0 = por %p1297_p12, %p1296_p8 }
  0x85   : > { %p1299_p5 = pnand %p1298_p0, %p1292_p13 }
  0x87   : > { %1302 = shalt.err (!%p1299_p5)
}
  0x88   : > { %s1303_s26 = scalar_lea.vmem %s1694_s25, 128  ;;  %s1445_s20 = smov [#allocation6]  }
  0x89   : > { %p1304_p9 = scmp.ne.s32.totalorder %s1694_s25, %s1303_s26  ;;  %s1308_s13 = sshll.u32 %s1445_s20, 4  ;;  %s1309_s13 = int_to_ptr.vmem [resolvable:$false] %s1308_s13 }
  0x8a   : > { %s1310_s7 = scalar_lea.vmem %s1309_s13, 256  ;;  %p1311_p1 = scmp.lt.s32.totalorder %s1694_s25, %s1309_s13 }
  0x8b   : > { %p1306_p2 = pnand %p1304_p9, %p1919_p7  ;;  %p1312_p3 = scmp.lt.s32.totalorder %s1310_s7, %s1303_s26 }
  0x8d   : > { %p1307_p4 = pneg %p1306_p2  ;;  %p1313_p11 = por %p1312_p3, %p1311_p1 }
  0x8f   : > { %p1314_p10 = pnand %p1313_p11, %p1307_p4 }
  0x91   : > { %1317 = shalt.err (!%p1314_p10)
}
  0x92   : > { %p1920_p13 = scmp.ne.s32.totalorder %s1909_s24, 0  ;;  %s384_s30 = scalar_lea.vmem [#allocation11], %s1609_s21 }
  0x93   : > { %s392_s1 = sshll.u32 %s384_s30, 4  ;;  %s1318_s16 = scalar_lea.hbm %s1700_s9, 128  ;;  %s393_s1 = int_to_ptr.vmem [resolvable:$true] %s392_s1 }
  0x94   : > { %1115 = dma.hbm_to_vmem [thread:$0]  (!%p1920_p13), %s1691_s23, 128, %s1694_s25, %s343_s27  }
  0x95   : > { %p1319_p6 = scmp.ne.s32.totalorder %s1700_s9, %s1318_s16  ;;  %s1323_s22 = scalar_lea.hbm %s1863_s2, 256 }
  0x96   : > { %p1324_p0 = scmp.lt.u32.totalorder %s1700_s9, %s1863_s2  ;;  %p1325_p5 = scmp.lt.u32.totalorder %s1323_s22, %s1318_s16 }
  0x97   : > { %p1321_p8 = pnand %p1319_p6, %p1919_p7  ;;  %p1327_p2 = scmp.lt.u32.totalorder %s1318_s16, %s1700_s9 }
  0x98   : > { %p1326_p9 = por %p1325_p5, %p1324_p0 }
  0x99   : > { %p1322_p12 = pneg %p1321_p8 }
  0x9a   : > { %p1328_p4 = por %p1327_p2, %p1326_p9 }
  0x9c   : > { %p1329_p1 = pnand %p1328_p4, %p1322_p12 }
  0x9e   : > { %1332 = shalt.err (!%p1329_p1)
}
  0x9f   : > { %s1333_s21 = scalar_lea.vmem %s393_s1, 128  ;;  %s1446_s23 = smov [#allocation11]  }
  0xa0   : > { %p1334_p3 = scmp.ne.s32.totalorder %s393_s1, %s1333_s21  ;;  %s1338_s25 = sshll.u32 %s1446_s23, 4  ;;  %s1339_s25 = int_to_ptr.vmem [resolvable:$false] %s1338_s25 }
  0xa1   : > { %s1340_s27 = scalar_lea.vmem %s1339_s25, 256  ;;  %p1341_p6 = scmp.lt.s32.totalorder %s393_s1, %s1339_s25 }
  0xa2   : > { %p1336_p11 = pnand %p1334_p3, %p1919_p7  ;;  %p1342_p8 = scmp.lt.s32.totalorder %s1340_s27, %s1333_s21 }
  0xa4   : > { %p1337_p10 = pneg %p1336_p11  ;;  %p1343_p13 = por %p1342_p8, %p1341_p6 }
  0xa6   : > { %p1344_p0 = pnand %p1343_p13, %p1337_p10 }
  0xa8   : > { %1347 = shalt.err (!%p1344_p0)
}
  0xa9   : > { %p1921_p5 = scmp.ne.s32.totalorder %s1909_s24, 0  ;;  %p1922_p12 = scmp.ne.s32.totalorder %s1902_s19, 0 }
  0xaa   : > { %s1747_s3 = sand.u32 (!%p1922_p12), 1, %s1422_s10   ;;  %p1923_p7 = scmp.ne.s32.totalorder (!%p1922_p12), %s1899_s17, 0 }
  0xab   : > { %1121 = dma.hbm_to_vmem [thread:$0]  (!%p1921_p5), %s1700_s9, 128, %s393_s1, %s1633_s18  }
  0xac   : > { %401 = sbr.rel (%p1922_p12) target bundleno = 1230 (0x4ce), region = 56  ;;  %s1750_s13 = sshll.u32 (!%p1922_p12), %s1747_s3, 3 }
  0xad   : > { %s404_s7 = scalar_lea.sflag (!%p1922_p12), [#allocation7], %s1747_s3  ;;  %s407_s30 = scalar_lea.vmem (!%p1922_p12), [#allocation6], %s1750_s13 }
  0xb3   : > { %1401 = dma.done.wait (%p1923_p7), %s404_s7, 128  }
  0xb4   : > { %1403 = vsyncadd (%p1923_p7), %s404_s7, 4294967168  ;;  %s412_s18 = sand.u32 1, %s1533_s15   ;;  %s416_s24 = scalar_lea.vmem [#allocation9], %s1750_s13 }
  0xb5   : > { %s413_s19 = scalar_lea.sflag [#allocation10], %s412_s18 }
  0xb6   : > { %1405 = dma.done.wait (%p1923_p7), %s413_s19, 256  }
  0xb7   : > { %1407 = vsyncadd (%p1923_p7), %s413_s19, 4294967040  ;;  %s425_s9 = scalar_lea.vmem [#allocation11], %s1750_s13  ;;  %p1924_p13 = scmp.eq.s32.totalorder %s1533_s15, 0 }
  0xb9   : > { %1409 = dma.done.wait (%p1924_p13), [#allocation13], 512   ;;  %p1925_p9 = pmov %p1924_p13 }
  0xba   : > { %vm508_vm0 = vcmask 261120   ;;  %v1447_v0 = vmov 0.0   ;;  %vm1448_vm1 = vmmov 0   ;;  %v1190_v1 = vld [vmem:[#allocation12] sm:$0xff]   ;;  %v1191_v2 = vld [vmem:[%s1866_s5] sm:$0xff]   ;;  %v1192_v3 = vld [vmem:[#allocation12 + $0x8] sm:$0xff]  }
  0xbb   : > { %1411 = vsyncadd (%p1925_p9), [#allocation13], 4294966784  ;;  %1053 = vmatprep.subr.bf16.mxu0 %v1447_v0  ;;  %1061 = vmatprep.subr.bf16.mxu1 %v1447_v0  ;;  %557 = vst.msk [vmem:[#allocation5] sm:$0xff] %vm508_vm0, %v1447_v0  ;;  %v1193_v4 = vld [vmem:[%s1866_s5 + $0x8] sm:$0xff]   ;;  %v558_v6 = vld [vmem:[%s416_s24] sm:$0xff]  ;;  %vm554_vm2 = vcmask 7168  }
  0xbc   : > { %1057 = vmatprep.mubr.msk.bf16.mxu0 %vm1448_vm1, %v1447_v0  ;;  %1065 = vmatprep.mubr.msk.bf16.mxu1 %vm1448_vm1, %v1447_v0  ;;  %v483_v5 = vld [vmem:[%s407_s30] sm:$0xff]  ;;  %v559_v8 = vpack.c.bf16 %v558_v6, %v558_v6  ;;  %v1449_v27 = vmov -inf   ;;  %556 = vst.msk [vmem:[#allocation4] sm:$0xff] %vm554_vm2, %v1447_v0  ;;  %vm745_vm3 = vcmask 64512   ;;  %v1450_v36 = vmov 0   ;;  %s1037_s23 = sshll.u32 %s1430_s12, 7 }
  0xbd   : > { %1054 = vmatpush3.bf16.msra.mxu0 %v1190_v1  ;;  %1062 = vmatpush3.bf16.msra.mxu1 %v1191_v2  ;;  %v484_v7 = vpack.c.bf16 %v483_v5, %v483_v5  ;;  %v1022_v9 = vld [vmem:[%s1865_s4] ss:$0 sm:$0xff]  ;;  %555 = vst.msk [vmem:[#allocation3] sm:$0xff] %vm554_vm2, %v1449_v27  ;;  %v1195_v28 = vld [vmem:[#allocation14 + $0x8] sm:$0xff]   ;;  %vm781_vm4 = vcmask 1043456   ;;  %s477_s25 = scalar_lea.vmem [#allocation15], %s1750_s13 }
  0xbe   : > { %1055 = vmatprep.subr.bf16.mxu0 %v1447_v0  ;;  %1063 = vmatprep.subr.bf16.mxu1 %v1447_v0  ;;  %v1026_v10 = vld [vmem:[%s1867_s6] ss:$0 sm:$0xff]  ;;  %s856_s27 = sshll.u32 %s477_s25, 4  ;;  %s1926_s18 = sld [smem:[#allocation29_spill]]  ;;  %s1813_s27 = int_to_ptr.vmem [resolvable:$true] %s856_s27 }
  0xbf   : > { %v1194_v26 = vld [vmem:[#allocation14] sm:$0xff]   ;;  %1188 = vset.pattern.permute.xlu0 %v1450_v36  ;;  %1189 = vset.pattern.permute.xlu1 %v1450_v36  ;;  %s842_s24 = scalar_lea.sflag [#allocation8], %s1747_s3  ;;  %p1927_p4 = scmp.ne.s32.totalorder %s1907_s29, 0 }
  0xc0   : > { %v560_v29 = vld [vmem:[%s425_s9] sm:$0xff]  ;;  %s1348_s9 = scalar_lea.vmem %s1813_s27, 128  ;;  %s1451_s12 = smov [#allocation15]  }
  0xc1   : > { %1056 = vmatpush3.bf16.msra.mxu0 %v1192_v3  ;;  %1064 = vmatpush3.bf16.msra.mxu1 %v1193_v4  ;;  %v561_v30 = vpack.c.bf16 %v560_v29, %v560_v29  ;;  %v1030_v41 = vld [vmem:[%s1869_s8] ss:$0 sm:$0xff]  ;;  %p1349_p2 = scmp.ne.s32.totalorder %s1813_s27, %s1348_s9  ;;  %s1352_s13 = sshll.u32 %s1451_s12, 4  ;;  %s1353_s13 = int_to_ptr.vmem [resolvable:$false] %s1352_s13 }
  0xc2   : > { %1069 = vmatprep.subr.bf16.mxu0 %v1447_v0  ;;  %1077 = vmatprep.subr.bf16.mxu1 %v1447_v0  ;;  %v769_v63 = vld [vmem:[#allocation5] sm:$0xff]  ;;  %s1354_s17 = scalar_lea.vmem %s1353_s13, 256  ;;  %p1355_p11 = scmp.lt.s32.totalorder %s1813_s27, %s1353_s13 }
  0xc3   : > { %v761_v57 = vld [vmem:[#allocation4] sm:$0xff]  ;;  %p1350_p1 = pnand %p1349_p2, %p1927_p4  ;;  %p1356_p10 = scmp.lt.s32.totalorder %s1354_s17, %s1348_s9 }
  0xc4   : > { %1058 = vmatmul.mubr.msk.bf16.vlgmr.msra.gmra.mrb[0].mxu0 %vm508_vm0, %v484_v7  ;;  %1066 = vmatmul.mubr.msk.bf16.vlgmr.msra.gmra.mrb[0].mxu1 %vm508_vm0, %v559_v8  ;;  %v744_v37 = vld [vmem:[#allocation3] sm:$0xff]  ;;  %s1811_s19 = scalar_lea.hbm %s1926_s18, %s1037_s23 }
  0xc5   : > { %1073 = vmatprep.mubr.msk.bf16.mxu0 %vm1448_vm1, %v1447_v0  ;;  %1079 = vmatprep.mubr.msk.bf16.mxu1 %vm1448_vm1, %v1447_v0  ;;  %p1351_p3 = pneg %p1350_p1  ;;  %p1357_p6 = por %p1356_p10, %p1355_p11 }
  0xc6   : > { %1070 = vmatpush3.bf16.msra.mxu0 %v1194_v26 }
  0xc7   : > { %1071 = vmatprep.subr.bf16.mxu0 %v1447_v0  ;;  %p1358_p8 = pnand %p1357_p6, %p1351_p3 }
  0xca   : > { %1072 = vmatpush3.bf16.msra.mxu0 %v1195_v28 }
  0xcb   : > { %1083 = vmatprep.subr.bf16.mxu0 %v1447_v0 }
  0xcd   : > { %1074 = vmatmul.mubr.msk.bf16.vlgmr.msra.gmra.mrb[4].mxu0 %vm508_vm0, %v561_v30 }
  0xce   : > { %1085 = vmatprep.mubr.msk.bf16.mxu0 %vm1448_vm1, %v1447_v0 }
 0x197   : > { %v546_v11 = vpop.f32.mrb[0].mxu0  ;;  %v623_v13 = vpop.f32.mrb[0].mxu1 }
 0x198   : > { %v547_v12 = vadd.f32 %v1022_v9, %v546_v11  ;;  %v1059_v14 = vpop.f32.mrb[1].mxu0  ;;  %v624_v15 = vadd.f32 %v1026_v10, %v623_v13  ;;  %v1067_v16 = vpop.f32.mrb[1].mxu1 }
 0x199   : > { %v549_v17 = vpop.f32.mrb[2].mxu0  ;;  %v626_v19 = vpop.f32.mrb[2].mxu1 }
 0x19a   : > { %v552_v18 = vmul.f32 0.17677669, %v547_v12  ;;  %v1060_v20 = vpop.f32.mrb[3].mxu0  ;;  %v697_v21 = vpack.c.bf16 %v624_v15, %v624_v15  ;;  %v1068_v22 = vpop.f32.mrb[3].mxu1 }
 0x19c   : > { %553 = vst.msk [vmem:[#allocation2] sm:$0xff] %vm508_vm0, %v552_v18  ;;  %v702_v23 = vsel %vm508_vm0, %v697_v21, 0 }
 0x19d   : > { %1078 = vmatpush3.bf16.xpose.msra.mxu1 %v702_v23 }
 0x1a0   : > { %v689_v42 = vpop.f32.mrb[4].mxu0 }
 0x1a1   : > { %v690_v43 = vadd.f32 %v1030_v41, %v689_v42  ;;  %v1075_v44 = vpop.f32.mrb[5].mxu0 }
 0x1a2   : > { %v692_v45 = vpop.f32.mrb[6].mxu0 }
 0x1a3   : > { %v695_v24 = vld [vmem:[#allocation2] sm:$0xff]  ;;  %v777_v46 = vpack.c.bf16 %v690_v43, %v690_v43  ;;  %v1076_v47 = vpop.f32.mrb[7].mxu0 }
 0x1a4   : > { %v696_v25 = vpack.c.bf16 %v695_v24, %v695_v24 }
 0x1a5   : > { %v783_v48 = vsel %vm781_vm4, %v777_v46, 0 }
 0x1a6   : > { %1080 = vmatmul.mubr.msk.bf16.vlgmr.msra.gmra.mrb[4].mxu1 %vm508_vm0, %v696_v25  ;;  %1084 = vmatpush3.bf16.msra.mxu0 %v783_v48 }
 0x279   : > { %v738_v31 = vpop.f32.mrb[4].mxu1 }
 0x27a   : > { %v1081_v32 = vpop.f32.mrb[5].mxu1  ;;  %v746_v33 = vsel %vm745_vm3, %v738_v31, -inf }
 0x27b   : > { %747 = vmax.xlane.f32.xlu0 %v746_v33  ;;  %v741_v34 = vpop.f32.mrb[6].mxu1 }
 0x27c   : > { %v1082_v35 = vpop.f32.mrb[7].mxu1 }
 0x308   : > { %v748_v38 = vpop.xlane.xlu0 %747 }
 0x309   : > { %v749_v39 = vmax.f32 %v744_v37, %v748_v38 }
 0x30b   : > { %v750_v40 = vsub.f32 %v744_v37, %v749_v39  ;;  %827 = vst.msk [vmem:[#allocation3] sm:$0xff] %vm554_vm2, %v749_v39  ;;  %755 = vperm.xlu0 %1188, %v749_v39  }
 0x30d   : > { %v751_v55 = vmul.f32 1.442695, %v750_v40 }
 0x38a   : > { %v756_v49 = vpop.permute.xlu0 %755 }
 0x38b   : > { %v758_v50 = vsub.f32 %v738_v31, %v756_v49 }
 0x38d   : > { %v759_v51 = vmul.f32 1.442695, %v758_v50 }
 0x38f   : > { %1196 = vpow2.f32 %v759_v51 }
 0x390   : > { %1198 = vpow2.f32 %v751_v55 }
 0x399   : > { %v1197_v52 = vpop.eup %1196 }
 0x39a   : > { %v763_v53 = vsel %vm745_vm3, %v1197_v52, 0.0  ;;  %v776_v54 = vpack.c.bf16 %v1197_v52, %v1197_v52  ;;  %v1199_v56 = vpop.eup %1198 }
 0x39b   : > { %764 = vadd.xlane.f32.xlu1 %v763_v53  ;;  %v762_v58 = vmul.f32 %v1199_v56, %v761_v57 }
 0x39c   : > { %1086 = vmatmul.mubr.msk.bf16.vlgmr.msra.gmra.mrb[8].mxu0 %vm745_vm3, %v776_v54 }
 0x3ac   : > { %772 = vperm.xlu1 %1189, %v1199_v56  }
 0x428   : > { %v765_v59 = vpop.xlane.xlu1 %764 }
 0x429   : > { %v766_v60 = vadd.f32 %v765_v59, %v762_v58 }
 0x42b   : > { %768 = vst.msk [vmem:[#allocation4] sm:$0xff] %vm554_vm2, %v766_v60 }
 0x42c   : > { %v773_v0 = vpop.permute.xlu1 %772 }
 0x42d   : > { %v775_v1 = vmul.f32 %v773_v0, %v769_v63 }
 0x432   : > { %v831_v61 = vld [vmem:[#allocation4] sm:$0xff] }
 0x433   : > { %1200 = vrcp.f32 %v831_v61 }
 0x43d   : > { %v1201_v62 = vpop.eup %1200 }
 0x43e   : > { %836 = vperm.xlu1 %1189, %v1201_v62  }
 0x46f   : > { %v819_v2 = vpop.f32.mrb[8].mxu0 }
 0x470   : > { %v825_v3 = vadd.f32 %v819_v2, %v775_v1  ;;  %v1087_v4 = vpop.f32.mrb[9].mxu0 }
 0x471   : > { %v822_v5 = vpop.f32.mrb[10].mxu0 }
 0x472   : > { %826 = vst.msk [vmem:[#allocation5] sm:$0xff] %vm508_vm0, %v825_v3  ;;  %v1088_v6 = vpop.f32.mrb[11].mxu0 }
 0x479   : > { %v833_v8 = vld [vmem:[#allocation5] sm:$0xff] }
 0x4bd   : > { %v837_v7 = vpop.permute.xlu1 %836 }
 0x4be   : > { %v839_v9 = vmul.f32 %v837_v7, %v833_v8 }
 0x4c0   : > { %840 = vst.msk [vmem:[%s477_s25] sm:$0xff] %vm508_vm0, %v839_v9 }
 0x4c1   : > { %1361 = shalt.err (!%p1358_p8)
}
 0x4c2   : > { %s1362_s3 = scalar_lea.hbm %s1811_s19, 128  ;;  %s1366_s16 = scalar_lea.hbm %s1926_s18, 256 }
 0x4c3   : > { %p1363_p0 = scmp.ne.s32.totalorder %s1811_s19, %s1362_s3  ;;  %p1367_p7 = scmp.lt.u32.totalorder %s1811_s19, %s1926_s18 }
 0x4c4   : > { %p1368_p13 = scmp.lt.u32.totalorder %s1366_s16, %s1362_s3  ;;  %p1370_p2 = scmp.lt.u32.totalorder %s1362_s3, %s1811_s19 }
 0x4c5   : > { %p1364_p5 = pnand %p1363_p0, %p1927_p4 }
 0x4c6   : > { %p1369_p9 = por %p1368_p13, %p1367_p7 }
 0x4c7   : > { %p1365_p12 = pneg %p1364_p5 }
 0x4c8   : > { %p1371_p1 = por %p1370_p2, %p1369_p9 }
 0x4ca   : > { %p1372_p3 = pnand %p1371_p1, %p1365_p12 }
 0x4cc   : > { %1375 = shalt.err (!%p1372_p3)
}
 0x4cd   : > { %1103 = dma.vmem_to_hbm [thread:$0]  (%p1927_p4), %s1813_s27, 128, %s1811_s19, %s842_s24  }
 0x4ce PF: > { %s1928_s22 = sld [smem:[#allocation20_spill]]  ;;  %s1929_s26 = sld [smem:[#allocation23_spill]] }
 0x4cf   : > { %s1930_s20 = sld [smem:[#allocation22_spill]] }
 0x4d4   : > { %s868_s21 = sand.u32 1, %s1928_s22   ;;  %p1931_p11 = scmp.ne.s32.totalorder %s1929_s26, 0 }
 0x4d5   : > { %p1932_p10 = scmp.ge.s32.totalorder %s1930_s20, 2  ;;  %s869_s23 = scalar_lea.sflag [#allocation8], %s868_s21 }
 0x4d7   : > { %p1123_p6 = pnand %p1932_p10, %p1931_p11 }
 0x4d9   : > { %1413 = dma.done.wait (!%p1123_p6), %s869_s23, 128  }
 0x4da   : > { %1415 = vsyncadd (!%p1123_p6), %s869_s23, 4294967168  ;;  %s29_s14 = sadd.s32 1, %s1930_s20   ;;  %s1933_s29 = sld [smem:[#allocation25_spill]] }
 0x4db   : > { %p26_p8 = scmp.ge.s32.totalorder %s29_s14, 4   ;;  %s1934_s12 = sld [smem:[#allocation21_spill]] }
 0x4dc   : > { %s1935_s13 = sld [smem:[#allocation24_spill]]  ;;  %s1936_s30 = smov %s1422_s10 }
 0x4dd   : > { %s1937_s10 = smov %s1426_s11  ;;  %28 = sbr.rel (!%p26_p8) target bundleno = 14 (0xe), region = 141 }
 0x4e0   : > { %s1938_s11 = smov %s1933_s29 }
 0x4e4   :  { %874 = vsyncpa [#allocation7], 1 }
 0x4e5   :  { %876 = vsyncpa [#allocation7 + $0x1], 1 }
 0x4e6   :  { %877 = vsyncpa [#allocation10], 1 }
 0x4e7   :  { %879 = vsyncpa [#allocation10 + $0x1], 1 }
 0x4e8   :  { %880 = vsyncpa [#allocation13], 1 }
 0x4e9   :  { %881 = vsyncpa [#allocation8], 1 }
 0x4ea   :  { %883 = vsyncpa [#allocation8 + $0x1], 1 }

</bundles_post_ra>
